<compile_context>
chip_gen: v7x
topology: tpu7x:2x2x1
jax: 0.10.0
libtpu: 0.0.40
codegen_flags: <defaults>
</compile_context>

<pallas_src>
import functools

import numpy as np
import jax
import jax.numpy as jnp
from jax.experimental import pallas as pl
from jax.experimental.pallas import tpu as pltpu


LANES = 128  # fused feature width = 2 * hidden_size (actor || critic)


# --------------------------------------------------------------------------
# Parameter construction (matches nn.Linear + orthogonal/zero init of spec).
# --------------------------------------------------------------------------
def _orthogonal(key, shape, gain=1.0):
    """Deterministic orthogonal init (like nn.init.orthogonal_), shape=(out, in)."""
    rows, cols = shape
    n = max(rows, cols)
    a = jax.random.normal(key, (n, n), dtype=jnp.float32)
    q, r = jnp.linalg.qr(a)
    q = q * jnp.sign(jnp.diag(r))[None, :]  # sign fix for a unique decomposition
    return gain * q[:rows, :cols]


def _make_params(key, num_inputs, num_outputs, hidden_size=64):
    """Per-layer params in nn.Linear layout, stored pre-transposed as (in, out)."""
    ks = jax.random.split(key, 6)
    g = float(np.sqrt(2.0))
    p = {}
    # actor: gains sqrt(2), sqrt(2), 1
    p["aw1"] = _orthogonal(ks[0], (hidden_size, num_inputs), g).T
    p["aw2"] = _orthogonal(ks[1], (hidden_size, hidden_size), g).T
    p["aw3"] = _orthogonal(ks[2], (num_outputs, hidden_size), 1.0).T
    # critic: gain sqrt(2) everywhere
    p["cw1"] = _orthogonal(ks[3], (hidden_size, num_inputs), g).T
    p["cw2"] = _orthogonal(ks[4], (hidden_size, hidden_size), g).T
    p["cw3"] = _orthogonal(ks[5], (1, hidden_size), g).T
    # nn.init.constant_(bias, 0)
    p["ab1"] = jnp.zeros((1, hidden_size), jnp.float32)
    p["ab2"] = jnp.zeros((1, hidden_size), jnp.float32)
    p["ab3"] = jnp.zeros((1, num_outputs), jnp.float32)
    p["cb1"] = jnp.zeros((1, hidden_size), jnp.float32)
    p["cb2"] = jnp.zeros((1, hidden_size), jnp.float32)
    p["cb3"] = jnp.zeros((1, 1), jnp.float32)
    return p


def _pack_params(p, num_inputs, num_outputs, hidden_size=64):
    """Fuse actor+critic into block-structured 128-lane weights (one array each)."""
    assert 2 * hidden_size == LANES, "fused layout assumes hidden_size == 64"
    assert num_outputs + 1 <= LANES
    h = hidden_size
    W = np.zeros((3, LANES, LANES), np.float32)
    # layer 1: [aw1 | cw1] occupies the first num_inputs rows (rest stays zero).
    W[0, :num_inputs, :h] = np.asarray(p["aw1"])
    W[0, :num_inputs, h:] = np.asarray(p["cw1"])
    # layer 2: block-diagonal.
    W[1, :h, :h] = np.asarray(p["aw2"])
    W[1, h:, h:] = np.asarray(p["cw2"])
    # layer 3: block-diagonal into the padded output lanes
    #          (logits -> lanes [0:num_outputs], value -> lane num_outputs).
    W[2, :h, :num_outputs] = np.asarray(p["aw3"])
    W[2, h:, num_outputs:num_outputs + 1] = np.asarray(p["cw3"])

    B = np.zeros((3, LANES), np.float32)
    B[0, :h] = np.asarray(p["ab1"])[0]
    B[0, h:] = np.asarray(p["cb1"])[0]
    B[1, :h] = np.asarray(p["ab2"])[0]
    B[1, h:] = np.asarray(p["cb2"])[0]
    B[2, :num_outputs] = np.asarray(p["ab3"])[0]
    B[2, num_outputs:num_outputs + 1] = np.asarray(p["cb3"])[0]
    return jnp.asarray(W), jnp.asarray(B)


# --------------------------------------------------------------------------
# Kernel
# --------------------------------------------------------------------------
def mlp_base_kernel(x_ref, w_ref, b_ref, out_ref, *, num_inputs):
    x = x_ref[...]                                     # (B, num_inputs)

    # Layer 1 (fused [actor | critic]): only the first `num_inputs` rows of
    # w_ref[0] are non-zero; static slice so the contraction matches x.
    w1 = w_ref[0, 0:num_inputs, :]                     # (num_inputs, 128)
    h = jnp.tanh(jnp.dot(x, w1, preferred_element_type=jnp.float32)
                 + b_ref[0:1, :])

    # Layer 2 (block-diagonal 128x128): one full-width MXU matmul.
    h = jnp.tanh(jnp.dot(h, w_ref[1], preferred_element_type=jnp.float32)
                 + b_ref[1:2, :])

    # Layer 3 (block-diagonal, no activation) -> lane-dense padded output:
    # lanes [0:num_outputs] = action logits, lane num_outputs = critic value,
    # remaining lanes are exactly zero (zero weight columns, zero bias).
    out_ref[...] = (jnp.dot(h, w_ref[2], preferred_element_type=jnp.float32)
                    + b_ref[2:3, :])


# --------------------------------------------------------------------------
# Wrapper
# --------------------------------------------------------------------------
def mlp_base_forward(x, w_packed, b_packed, num_outputs):
    """Returns (value [B,1], action_logits [B,num_outputs])."""
    B, num_inputs = x.shape
    vmem = pl.BlockSpec(memory_space=pltpu.MemorySpace.VMEM)

    flops = 2 * B * (num_inputs * LANES + LANES * LANES + LANES * LANES)
    bytes_accessed = 4 * (int(x.size) + int(w_packed.size)
                          + int(b_packed.size) + B * LANES)
    cost = pl.CostEstimate(flops=int(flops),
                           transcendentals=int(2 * B * LANES),
                           bytes_accessed=int(bytes_accessed))

    out = pl.pallas_call(
        functools.partial(mlp_base_kernel, num_inputs=num_inputs),
        out_shape=jax.ShapeDtypeStruct((B, LANES), jnp.float32),
        in_specs=[vmem, vmem, vmem],
        out_specs=vmem,
        cost_estimate=cost,
    )(x, w_packed, b_packed)

    action_logits = out[:, :num_outputs]
    value = out[:, num_outputs:num_outputs + 1]
    # TODO(synk): self.dist(action_logits) constructs an external distribution
    # head (e.g. Categorical/DiagGaussian); raw logits are returned instead.
    return value, action_logits


# --------------------------------------------------------------------------
# Pure-JAX reference (unfused, per-layer params)
# --------------------------------------------------------------------------
def _reference(x, p):
    h = jnp.tanh(x @ p["aw1"] + p["ab1"])
    h = jnp.tanh(h @ p["aw2"] + p["ab2"])
    logits = h @ p["aw3"] + p["ab3"]
    c = jnp.tanh(x @ p["cw1"] + p["cb1"])
    c = jnp.tanh(c @ p["cw2"] + p["cb2"])
    value = c @ p["cw3"] + p["cb3"]
    return value, logits


if __name__ == "__main__":
    key = jax.random.PRNGKey(0)
    k_x, k_p = jax.random.split(key)

    batch = 8
    num_inputs = 32
    num_outputs = 16
    hidden_size = 64

    x = jax.random.normal(k_x, (batch, num_inputs), dtype=jnp.float32)
    params = _make_params(k_p, num_inputs, num_outputs, hidden_size)
    w_packed, b_packed = _pack_params(params, num_inputs, num_outputs, hidden_size)

    value, logits = mlp_base_forward(x, w_packed, b_packed, num_outputs)
    value = jax.block_until_ready(value)
    logits = jax.block_until_ready(logits)

    ref_value, ref_logits = _reference(x, params)
    np.testing.assert_allclose(np.asarray(value), np.asarray(ref_value),
                               rtol=1e-5, atol=1e-5)
    np.testing.assert_allclose(np.asarray(logits), np.asarray(ref_logits),
                               rtol=1e-5, atol=1e-5)

    print("KERNEL_OK")
</pallas_src>

<mosaic_0001>
module attributes {stable_mosaic.version = 11 : i64} {
  func.func @mlp_base_kernel(%arg0: memref<8x32xf32, #tpu.memory_space<vmem>>, %arg1: memref<3x128x128xf32, #tpu.memory_space<vmem>>, %arg2: memref<3x128xf32, #tpu.memory_space<vmem>>, %arg3: memref<8x128xf32, #tpu.memory_space<vmem>>) attributes {dimension_semantics = [], scalar_prefetch = 0 : i64, scratch_operands = 0 : i64, tpu.core_type = #tpu.core_type<tc>} {
    %c0 = arith.constant 0 : index
    %c0_0 = arith.constant 0 : index
    %0 = vector.load %arg0[%c0, %c0_0] : memref<8x32xf32, #tpu.memory_space<vmem>>, vector<8x32xf32>
    %c0_1 = arith.constant 0 : index
    %c0_2 = arith.constant 0 : index
    %c0_3 = arith.constant 0 : index
    %1 = vector.load %arg1[%c0_1, %c0_2, %c0_3] : memref<3x128x128xf32, #tpu.memory_space<vmem>>, vector<1x32x128xf32>
    %2 = vector.shape_cast %1 : vector<1x32x128xf32> to vector<32x128xf32>
    %cst = arith.constant dense<0.000000e+00> : vector<8x128xf32>
    %3 = tpu.matmul %0, %2, %cst {dimension_numbers = #tpu.dot_dimension_numbers<[1], [0], [0], [1], [0, 0, 1, 1], [], []>} : vector<8x32xf32>, vector<32x128xf32>, vector<8x128xf32> -> vector<8x128xf32>
    %c0_4 = arith.constant 0 : index
    %c0_5 = arith.constant 0 : index
    %4 = vector.load %arg2[%c0_4, %c0_5] : memref<3x128xf32, #tpu.memory_space<vmem>>, vector<1x128xf32>
    %5 = vector.broadcast %4 : vector<1x128xf32> to vector<8x128xf32>
    %6 = arith.addf %3, %5 : vector<8x128xf32>
    %7 = math.tanh %6 : vector<8x128xf32>
    %c1 = arith.constant 1 : index
    %c0_6 = arith.constant 0 : index
    %c0_7 = arith.constant 0 : index
    %8 = vector.load %arg1[%c1, %c0_6, %c0_7] : memref<3x128x128xf32, #tpu.memory_space<vmem>>, vector<1x128x128xf32>
    %9 = vector.shape_cast %8 : vector<1x128x128xf32> to vector<128x128xf32>
    %cst_8 = arith.constant dense<0.000000e+00> : vector<8x128xf32>
    %10 = tpu.matmul %7, %9, %cst_8 {dimension_numbers = #tpu.dot_dimension_numbers<[1], [0], [0], [1], [0, 0, 1, 1], [], []>} : vector<8x128xf32>, vector<128x128xf32>, vector<8x128xf32> -> vector<8x128xf32>
    %c1_9 = arith.constant 1 : index
    %c0_10 = arith.constant 0 : index
    %11 = vector.load %arg2[%c1_9, %c0_10] : memref<3x128xf32, #tpu.memory_space<vmem>>, vector<1x128xf32>
    %12 = vector.broadcast %11 : vector<1x128xf32> to vector<8x128xf32>
    %13 = arith.addf %10, %12 : vector<8x128xf32>
    %14 = math.tanh %13 : vector<8x128xf32>
    %c2 = arith.constant 2 : index
    %c0_11 = arith.constant 0 : index
    %c0_12 = arith.constant 0 : index
    %15 = vector.load %arg1[%c2, %c0_11, %c0_12] : memref<3x128x128xf32, #tpu.memory_space<vmem>>, vector<1x128x128xf32>
    %16 = vector.shape_cast %15 : vector<1x128x128xf32> to vector<128x128xf32>
    %cst_13 = arith.constant dense<0.000000e+00> : vector<8x128xf32>
    %17 = tpu.matmul %14, %16, %cst_13 {dimension_numbers = #tpu.dot_dimension_numbers<[1], [0], [0], [1], [0, 0, 1, 1], [], []>} : vector<8x128xf32>, vector<128x128xf32>, vector<8x128xf32> -> vector<8x128xf32>
    %c2_14 = arith.constant 2 : index
    %c0_15 = arith.constant 0 : index
    %18 = vector.load %arg2[%c2_14, %c0_15] : memref<3x128xf32, #tpu.memory_space<vmem>>, vector<1x128xf32>
    %19 = vector.broadcast %18 : vector<1x128xf32> to vector<8x128xf32>
    %20 = arith.addf %17, %19 : vector<8x128xf32>
    %c0_16 = arith.constant 0 : index
    %c0_17 = arith.constant 0 : index
    %21 = vector.load %arg3[%c0_16, %c0_17] : memref<8x128xf32, #tpu.memory_space<vmem>>, vector<8x128xf32>
    tpu.vector_store %arg3[%c0_16, %c0_17], %20 {strides = array<i32>} : memref<8x128xf32, #tpu.memory_space<vmem>>, vector<8x128xf32>,
    return
  }
}

</mosaic_0001>

<bundles_post_ra>
// kernel: tpu_custom_call.1
= control target key start
LH: loop header
LB: loop body
LE: loop exit
PB: predicated region body
PF: predicated region fallthrough
CT: control target
= control target key end

     0   :  { %8 = vsyncpa [#allocation3], 0  ;;  %s691_s0 = inlined_call_operand.hbm [shape: f32[8,32], index: 0, kind: input, shape index: {}]   ;;  %s692_s1 = inlined_call_operand.hbm [shape: f32[3,128,128], index: 1, kind: input, shape index: {}]   ;;  %s693_s2 = inlined_call_operand.vmem [shape: f32[3,128], index: 2, kind: input, shape index: {}]   ;;  %s694_s3 = inlined_call_operand.hbm [shape: f32[8,128], index: 3, kind: output, shape index: {}]  }
   0x1   :  { %9 = vsyncpa [#allocation6], 0 }
   0x2   :  { %10 = vsyncpa [#allocation4], 0  ;;  %s590_s12 = smov [#allocation2]   ;;  %s591_s14 = smov [#allocation5]  }
   0x3   :  { %s17_s13 = sshll.u32 %s590_s12, 4  ;;  %s26_s15 = sshll.u32 %s591_s14, 4  ;;  %s18_s13 = int_to_ptr.vmem [resolvable:$true] %s17_s13  ;;  %s618_s15 = int_to_ptr.vmem [resolvable:$true] %s26_s15 }
   0x4   :  { %s518_s18 = scalar_lea.hbm %s691_s0, 128 }
   0x5   :  { %p519_p0 = scmp.ne.s32.totalorder %s691_s0, %s518_s18  ;;  %p522_p1 = scmp.lt.u32.totalorder %s518_s18, %s691_s0 }
   0x7   :  { %p524_p2 = pnand %p522_p1, %p519_p0 }
   0x9   :  { %527 = shalt.err (!%p524_p2)
}
   0xa   :  { %s528_s23 = scalar_lea.vmem %s18_s13, 128  ;;  %p533_p4 = scmp.lt.s32.totalorder %s18_s13, %s18_s13 }
   0xb   :  { %p529_p3 = scmp.ne.s32.totalorder %s18_s13, %s528_s23  ;;  %p534_p5 = scmp.lt.s32.totalorder %s528_s23, %s528_s23 }
   0xd   :  { %p535_p6 = por %p534_p5, %p533_p4 }
   0xf   :  { %p536_p7 = pnand %p535_p6, %p529_p3 }
  0x11   :  { %539 = shalt.err (!%p536_p7)
}
  0x12   :  { %20 = dma.hbm_to_vmem [thread:$0]  %s691_s0, 128, %s18_s13, [#allocation3]  }
  0x13   :  { %s540_s28 = scalar_lea.hbm %s692_s1, 6144 }
  0x14   :  { %p541_p8 = scmp.ne.s32.totalorder %s692_s1, %s540_s28  ;;  %p544_p9 = scmp.lt.u32.totalorder %s540_s28, %s692_s1 }
  0x16   :  { %p546_p10 = pnand %p544_p9, %p541_p8 }
  0x18   :  { %549 = shalt.err (!%p546_p10)
}
  0x19   :  { %s550_s6 = scalar_lea.vmem %s618_s15, 6144  ;;  %p555_p12 = scmp.lt.s32.totalorder %s618_s15, %s618_s15 }
  0x1a   :  { %p551_p11 = scmp.ne.s32.totalorder %s618_s15, %s550_s6  ;;  %p556_p13 = scmp.lt.s32.totalorder %s550_s6, %s550_s6 }
  0x1c   :  { %p557_p0 = por %p556_p13, %p555_p12 }
  0x1e   :  { %p558_p1 = pnand %p557_p0, %p551_p11 }
  0x20   :  { %561 = shalt.err (!%p558_p1)
}
  0x21   :  { %s592_s0 = smov 128   ;;  %s593_s7 = smov 8  }
  0x22   :  { %32 = dma.hbm_to_vmem [thread:$0]  %s692_s1, 6144, %s618_s15, [#allocation6], %s592_s0, %s592_s0, %s593_s7  }
  0x23   :  { %584 = dma.done.wait [#allocation3], 128  }
  0x24   :  { %585 = vsyncadd [#allocation3], 4294967168 }
  0x25   :  { %586 = dma.done.wait [#allocation6], 6144  }
  0x26   :  { %587 = vsyncadd [#allocation6], 4294961152  ;;  %v594_v0 = vmov 0.0|0.0   ;;  %vm595_vm0 = vmmov 0   ;;  %v596_v1 = vmov 0.0   ;;  %v42_v2 = vld [vmem:[#allocation5] sm:$0xff] }
  0x27   :  { %452 = vmatprep.subr.bf16.mxu0 %v594_v0  ;;  %379 = vmatprep.mubr.msk.f32.mxu0 %vm595_vm0, %v596_v1  ;;  %v43_v3 = vld [vmem:[#allocation5 + $0x8] sm:$0xff]  ;;  %v44_v4 = vld [vmem:[#allocation5 + $0x10] sm:$0xff]  ;;  %v45_v6 = vld [vmem:[#allocation5 + $0x18] sm:$0xff]  ;;  %vm51_vm1 = vcmask 261120   ;;  %s597_s15 = smov [#allocation7]  }
  0x28   :  { %458 = vmatprep.subr.bf16.mxu1 %v594_v0  ;;  %414 = vmatprep.mubr.msk.f32.mxu1 %vm595_vm0, %v596_v1  ;;  %v453_v5 = vpack.c.bf16 %v43_v3, %v42_v2  ;;  %v127_v7 = vld [vmem:[#allocation5 + $0x80] sm:$0xff]  ;;  %v128_v8 = vld [vmem:[#allocation5 + $0x88] sm:$0xff]  ;;  %v129_v9 = vld [vmem:[#allocation5 + $0x90] sm:$0xff]  ;;  %v456_v11 = vpack.c.bf16 %v45_v6, %v44_v4  ;;  %s318_s16 = sshll.u32 %s597_s15, 4  ;;  %s319_s16 = int_to_ptr.vmem [resolvable:$true] %s318_s16 }
  0x29   :  { %v130_v10 = vld [vmem:[#allocation5 + $0x98] sm:$0xff]  ;;  %v459_v12 = vpack.c.bf16 %v128_v8, %v127_v7  ;;  %v131_v14 = vld [vmem:[#allocation5 + $0xa0] sm:$0xff]  ;;  %v132_v15 = vld [vmem:[#allocation5 + $0xa8] sm:$0xff]  ;;  %s562_s17 = scalar_lea.vmem %s319_s16, 128  ;;  %p567_p3 = scmp.lt.s32.totalorder %s319_s16, %s319_s16 }
  0x2a   :  { %454 = vmatpush3.bf16.msra.mxu0 %v453_v5  ;;  %v462_v13 = vpack.c.bf16 %v130_v10, %v129_v9  ;;  %v41_v16 = vld [vmem:[#allocation2] sm:$0xff]  ;;  %v465_v17 = vpack.c.bf16 %v132_v15, %v131_v14  ;;  %v133_v18 = vld [vmem:[#allocation5 + $0xb0] sm:$0xff]  ;;  %v135_v21 = vld [vmem:[#allocation5 + $0xc0] sm:$0xff]  ;;  %p563_p2 = scmp.ne.s32.totalorder %s319_s16, %s562_s17  ;;  %p568_p4 = scmp.lt.s32.totalorder %s562_s17, %s562_s17 }
  0x2b   :  { %455 = vmatprep.subr.bf16.mxu0 %v594_v0  ;;  %460 = vmatpush3.bf16.msra.mxu1 %v459_v12  ;;  %v134_v19 = vld [vmem:[#allocation5 + $0xb8] sm:$0xff]  ;;  %v136_v22 = vld [vmem:[#allocation5 + $0xc8] sm:$0xff]  ;;  %v137_v24 = vld [vmem:[#allocation5 + $0xd0] sm:$0xff] }
  0x2c   :  { %461 = vmatprep.subr.bf16.mxu1 %v594_v0  ;;  %v468_v20 = vpack.c.bf16 %v134_v19, %v133_v18  ;;  %v471_v23 = vpack.c.bf16 %v136_v22, %v135_v21  ;;  %v138_v25 = vld [vmem:[#allocation5 + $0xd8] sm:$0xff]  ;;  %v139_v27 = vld [vmem:[#allocation5 + $0xe0] sm:$0xff]  ;;  %v140_v28 = vld [vmem:[#allocation5 + $0xe8] sm:$0xff]  ;;  %p569_p5 = por %p568_p4, %p567_p3 }
  0x2d   :  { %v474_v26 = vpack.c.bf16 %v138_v25, %v137_v24  ;;  %v477_v29 = vpack.c.bf16 %v140_v28, %v139_v27  ;;  %v141_v30 = vld [vmem:[#allocation5 + $0xf0] sm:$0xff]  ;;  %v142_v31 = vld [vmem:[#allocation5 + $0xf8] sm:$0xff]  ;;  %v220_v33 = vld [vmem:[#allocation5 + $0x100] sm:$0xff] }
  0x2e   :  { %457 = vmatpush3.bf16.msra.mxu0 %v456_v11  ;;  %v480_v32 = vpack.c.bf16 %v142_v31, %v141_v30  ;;  %v221_v34 = vld [vmem:[#allocation5 + $0x108] sm:$0xff]  ;;  %v222_v35 = vld [vmem:[#allocation5 + $0x110] sm:$0xff]  ;;  %v223_v37 = vld [vmem:[#allocation5 + $0x118] sm:$0xff]  ;;  %p570_p6 = pnand %p569_p5, %p563_p2 }
  0x2f   :  { %482 = vmatprep.subr.bf16.mxu0 %v594_v0  ;;  %463 = vmatpush3.bf16.msra.mxu1 %v462_v13  ;;  %v483_v36 = vpack.c.bf16 %v221_v34, %v220_v33  ;;  %v486_v38 = vpack.c.bf16 %v223_v37, %v222_v35  ;;  %v224_v39 = vld [vmem:[#allocation5 + $0x120] sm:$0xff]  ;;  %v225_v40 = vld [vmem:[#allocation5 + $0x128] sm:$0xff]  ;;  %v226_v42 = vld [vmem:[#allocation5 + $0x130] sm:$0xff] }
  0x30   :  { %464 = vmatprep.subr.bf16.mxu1 %v594_v0  ;;  %v489_v41 = vpack.c.bf16 %v225_v40, %v224_v39  ;;  %v227_v43 = vld [vmem:[#allocation5 + $0x138] sm:$0xff]  ;;  %v228_v45 = vld [vmem:[#allocation5 + $0x140] sm:$0xff]  ;;  %v229_v46 = vld [vmem:[#allocation5 + $0x148] sm:$0xff] }
  0x31   :  { %380 = vmatmul.mubr.msk.f32.vlgmr.msra.gmra.mrb[0].mxu0 %vm51_vm1, %v41_v16  ;;  %v492_v44 = vpack.c.bf16 %v227_v43, %v226_v42  ;;  %v495_v47 = vpack.c.bf16 %v229_v46, %v228_v45  ;;  %v328_v48 = vld [vmem:[%s693_s2] ss:$0 sm:$0xff]  ;;  %v230_v53 = vld [vmem:[#allocation5 + $0x150] sm:$0xff]  ;;  %v232_v56 = vld [vmem:[#allocation5 + $0x160] sm:$0xff] }
  0x32   :  { %449 = vmatprep.mubr.msk.f32.mxu0 %vm595_vm0, %v596_v1  ;;  %484 = vmatpush3.bf16.msra.mxu0 %v483_v36  ;;  %v231_v54 = vld [vmem:[#allocation5 + $0x158] sm:$0xff]  ;;  %v233_v57 = vld [vmem:[#allocation5 + $0x168] sm:$0xff]  ;;  %v234_v59 = vld [vmem:[#allocation5 + $0x170] sm:$0xff] }
  0x33   :  { %466 = vmatpush3.bf16.msra.mxu1 %v465_v17  ;;  %485 = vmatprep.subr.bf16.mxu0 %v594_v0  ;;  %v498_v55 = vpack.c.bf16 %v231_v54, %v230_v53  ;;  %v501_v58 = vpack.c.bf16 %v233_v57, %v232_v56  ;;  %v235_v60 = vld [vmem:[#allocation5 + $0x178] sm:$0xff] }
  0x34   :  { %467 = vmatprep.subr.bf16.mxu1 %v594_v0  ;;  %v504_v61 = vpack.c.bf16 %v235_v60, %v234_v59  ;;  %v330_v62 = vld [vmem:[%s693_s2 + $0x1] ss:$0 sm:$0xff]  ;;  %v331_v4 = vld [vmem:[%s693_s2 + $0x2] ss:$0 sm:$0xff] }
  0x36   :  { %487 = vmatpush3.bf16.msra.mxu0 %v486_v38 }
  0x37   :  { %469 = vmatpush3.bf16.msra.mxu1 %v468_v20  ;;  %488 = vmatprep.subr.bf16.mxu0 %v594_v0 }
  0x38   :  { %470 = vmatprep.subr.bf16.mxu1 %v594_v0 }
  0x3a   :  { %490 = vmatpush3.bf16.msra.mxu0 %v489_v41 }
  0x3b   :  { %472 = vmatpush3.bf16.msra.mxu1 %v471_v23  ;;  %491 = vmatprep.subr.bf16.mxu0 %v594_v0 }
  0x3c   :  { %473 = vmatprep.subr.bf16.mxu1 %v594_v0 }
  0x3e   :  { %493 = vmatpush3.bf16.msra.mxu0 %v492_v44 }
  0x3f   :  { %475 = vmatpush3.bf16.msra.mxu1 %v474_v26  ;;  %494 = vmatprep.subr.bf16.mxu0 %v594_v0 }
  0x40   :  { %476 = vmatprep.subr.bf16.mxu1 %v594_v0 }
  0x42   :  { %496 = vmatpush3.bf16.msra.mxu0 %v495_v47 }
  0x43   :  { %478 = vmatpush3.bf16.msra.mxu1 %v477_v29  ;;  %497 = vmatprep.subr.bf16.mxu0 %v594_v0 }
  0x44   :  { %479 = vmatprep.subr.bf16.mxu1 %v594_v0 }
  0x46   :  { %499 = vmatpush3.bf16.msra.mxu0 %v498_v55 }
  0x47   :  { %481 = vmatpush3.bf16.msra.mxu1 %v480_v32  ;;  %500 = vmatprep.subr.bf16.mxu0 %v594_v0 }
  0x4a   :  { %502 = vmatpush3.bf16.msra.mxu0 %v501_v58 }
  0x4b   :  { %503 = vmatprep.subr.bf16.mxu0 %v594_v0 }
  0x4e   :  { %505 = vmatpush3.bf16.msra.mxu0 %v504_v61 }
 0x104   :  { %v121_v49 = vpop.f32.mrb[0].mxu0 }
 0x105   :  { %v122_v50 = vadd.f32 %v328_v48, %v121_v49  ;;  %v381_v51 = vpop.f32.mrb[1].mxu0 }
 0x107   :  { %514 = vtanh.f32 %v122_v50 }
 0x111   :  { %v515_v52 = vpop.eup %514 }
 0x112   :  { %415 = vmatmul.mubr.f32.vlgmr.msra.gmra.mrb[0].mxu1 %v515_v52 }
 0x1e5   :  { %v214_v63 = vpop.f32.mrb[0].mxu1 }
 0x1e6   :  { %v215_v1 = vadd.f32 %v330_v62, %v214_v63  ;;  %v416_v2 = vpop.f32.mrb[1].mxu1 }
 0x1e8   :  { %516 = vtanh.f32 %v215_v1 }
 0x1f2   :  { %v517_v3 = vpop.eup %516 }
 0x1f3   :  { %450 = vmatmul.mubr.f32.vlgmr.msra.gmra.mrb[2].mxu0 %v517_v3 }
 0x2c6   :  { %v307_v5 = vpop.f32.mrb[2].mxu0 }
 0x2c7   :  { %v308_v6 = vadd.f32 %v331_v4, %v307_v5  ;;  %v451_v0 = vpop.f32.mrb[3].mxu0 }
 0x2c9   :  { %311 = vst [vmem:[#allocation7] sm:$0xff] %v308_v6 }
 0x2ca   :  { %573 = shalt.err (!%p570_p6)
}
 0x2cb   :  { %s574_s20 = scalar_lea.hbm %s694_s3, 128 }
 0x2cc   :  { %p575_p7 = scmp.ne.s32.totalorder %s694_s3, %s574_s20  ;;  %p578_p8 = scmp.lt.u32.totalorder %s574_s20, %s694_s3 }
 0x2ce   :  { %p580_p9 = pnand %p578_p8, %p575_p7 }
 0x2d0   :  { %583 = shalt.err (!%p580_p9)
}
 0x2d1   :  { %321 = dma.vmem_to_hbm [thread:$0]  %s319_s16, 128, %s694_s3, [#allocation4]  }
 0x2d2   :  { %588 = dma.done.wait [#allocation4], 128  }
 0x2d3   :  { %589 = vsyncadd [#allocation4], 4294967168 }
 0x2d4   :  { %325 = vsyncpa [#allocation3], 1 }
 0x2d5   :  { %326 = vsyncpa [#allocation6], 1 }
 0x2d6   :  { %327 = vsyncpa [#allocation4], 1 }

</bundles_post_ra>
